<compile_context>
chip_gen: v5e
topology: v5e:2x2
jax: 0.10.0
libtpu: 0.0.40
codegen_flags: <defaults>
</compile_context>

<pallas_src>
import functools

import numpy as np
import jax
import jax.numpy as jnp
from jax import lax
from jax.experimental import pallas as pl
from jax.experimental.pallas import tpu as pltpu


# ------------------------------ small helpers --------------------------------
def _rup(x, m):
    return ((int(x) + m - 1) // m) * m


def _pow2_floor(x):
    x = max(int(x), 1)
    return 1 << (x.bit_length() - 1)


# ------------------------------- kernel A ------------------------------------
def _dist_kernel(feat_ref, d2_ref):
    """Per-bin pairwise squared Euclidean distances for a block of bins."""
    feat = feat_ref[...]                                      # (btA, S, fd) f32
    fsq = feat * feat
    sq_col = jnp.sum(fsq, axis=-1, keepdims=True)             # (btA, S, 1)
    sq_row = jnp.sum(fsq, axis=-1)[:, None, :]                # (btA, 1, S)  XLU lane reduce
    gram = jnp.einsum('bmd,bnd->bmn', feat, feat,
                      preferred_element_type=jnp.float32)     # (btA, S, S)  MXU
    d2_ref[...] = sq_col + sq_row - 2.0 * gram


# ------------------------------- kernel B ------------------------------------
def _trip_loss_kernel(d2t_ref, hp3_ref, loss_ref, dq_ref, *scratch,
                      margin, k_way, bin_num, unrolled):
    """Lane-dense triplet loss + query/prototype distances for a block of bins.

    d2t_ref: (S, S, bt) squared distances, bins on the 128-lane axis.
    hp3_ref: (S, S, 1) same-label mask (hn derived in-kernel).
    """
    s_num = d2t_ref.shape[0]
    bt = d2t_ref.shape[2]

    dist = jnp.sqrt(jnp.maximum(d2t_ref[...], 0.0))           # (S, S, bt): dist[m, a, b]
    hp3 = hp3_ref[...]                                         # (S, S, 1)
    hn3 = 1.0 - hp3

    # query -> prototype distances, reduced over this block's bins.
    # Zero-padded bins have dist == 0 and contribute 0 (no mask needed).
    dq_ref[...] = jnp.sum(dist[k_way:, :k_way, :], axis=-1)[None]     # (1, Q, k)

    # ---- triplet loop over the positive index j (VALU-bound region) ---------
    # axes of the accumulators: [negative, anchor, bin]
    acc_s = jnp.zeros((s_num, s_num, bt), jnp.float32)
    acc_c = jnp.zeros((s_num, s_num, bt), jnp.float32)

    def step(dpos, hp_j, a_s, a_c):
        diff = (margin + dpos) - dist                          # (S, S, bt)
        ph = jnp.where(diff > 0.0, hp_j, 0.0)                  # shared predicate * hp[j, anchor]
        return a_s + diff * ph, a_c + ph                       # diff*ph == relu(diff)*hp[j,a]

    if unrolled:                                               # small S: static unroll
        for j in range(s_num):
            acc_s, acc_c = step(dist[j:j + 1], hp3[j:j + 1], acc_s, acc_c)
    else:                                                      # large S: fori + VMEM-staged rows
        dist_vm = scratch[0]
        dist_vm[...] = dist

        def body(j, carry):
            a_s, a_c = carry
            dpos = dist_vm[pl.ds(j, 1), :, :]                  # plain strided vld
            hp_j = hp3_ref[pl.ds(j, 1), :, :]
            return step(dpos, hp_j, a_s, a_c)

        acc_s, acc_c = lax.fori_loop(0, s_num, body, (acc_s, acc_c), unroll=2)

    # hn is independent of j -> applied once after the loop (hoisted).
    tot = jnp.sum(jnp.sum(acc_s * hn3, axis=0), axis=0, keepdims=True)   # (1, bt)
    cnt = jnp.sum(jnp.sum(acc_c * hn3, axis=0), axis=0, keepdims=True)   # (1, bt)
    mean_b = jnp.where(cnt > 0.0, tot / jnp.maximum(cnt, 1.0), 0.0)      # per-bin loss mean

    # mask zero-padded bins (their mean would be exactly `margin`) and reduce
    # to one per-block partial sum.
    lane = lax.broadcasted_iota(jnp.int32, (1, bt), 1)
    valid = (pl.program_id(0) * bt + lane) < bin_num
    loss_ref[...] = jnp.sum(jnp.where(valid, mean_b, 0.0),
                            axis=1, keepdims=True)[None]                 # (1, 1, 1)


# --------------------------------- wrapper -----------------------------------
def trip_forward(inpt, label_list, k_way, n_shot, query, margin=0.2):
    """JAX/Pallas equivalent of trip.forward(inpt, label)."""
    inpt = jnp.asarray(inpt, jnp.float32)
    label = jnp.concatenate([jnp.asarray(l) for l in label_list]).astype(jnp.int32)

    bin_num, _, fd = inpt.shape
    support = jnp.mean(
        inpt[:, :k_way * n_shot, :].reshape(bin_num, k_way, n_shot, fd), axis=2)
    queries = inpt[:, k_way * n_shot:, :]
    feature = jnp.concatenate([support, queries], axis=1)        # (bin, S, fd)
    s_num = feature.shape[1]
    q_num = s_num - k_way
    assert label.shape[0] == s_num, "label must cover prototypes + queries"

    hp3 = (label[:, None] == label[None, :]).astype(jnp.float32)[:, :, None]  # (S, S, 1)

    # ---- generation/padding-aware tile sizing --------------------------------
    try:
        vmem_phys = int(pltpu.get_tpu_info().vmem_capacity_bytes)
    except Exception:
        vmem_phys = 64 * 1024 * 1024                 # conservative (v7x-sized) fallback
    vmem_limit = min(vmem_phys * 3 // 4, 100 * 1024 * 1024)   # ~96 MiB v5e/v6e, ~48 MiB v7x
    block_budget = vmem_limit // 2                   # headroom for double buffering / misc

    # kernel-A live bytes per bin, counted at (8,128)-padded tile sizes:
    # feature block (double-buffered) + fsq + {gram, d2, d2-out double-buffered}.
    per_bin_a = 4 * (3 * _rup(s_num, 8) * _rup(fd, 128)
                     + 4 * _rup(s_num, 8) * _rup(s_num, 128))
    cap_a = max(1, block_budget // per_bin_a)

    if bin_num >= 256:
        bt_b = 128                                        # moderate bins/block, lane-dense
        bin_pad = _rup(bin_num, bt_b)
        bt_a = max(1, min(128, _pow2_floor(cap_a)))       # power of 2 -> divides bin_pad
    else:
        # Tiny bin counts: kernel B runs as one full block (last-dim blocking must be a
        # multiple of 128 or the full extent); kernel A still gets >= 2 blocks so v7x
        # megacore engages on the bin axis.
        want = -(-bin_num // 2) if bin_num > 1 else 1
        bt_a = max(1, min(cap_a, want))
        bin_pad = bt_a * (-(-bin_num // bt_a))
        bt_b = bin_pad
    n_blk_a = bin_pad // bt_a
    n_blk_b = bin_pad // bt_b

    if bin_pad != bin_num:
        feature = jnp.concatenate(
            [feature, jnp.zeros((bin_pad - bin_num, s_num, fd), feature.dtype)], axis=0)

    cparams = pltpu.CompilerParams(dimension_semantics=("parallel",),
                                   vmem_limit_bytes=int(vmem_limit))

    # ---- kernel A: per-bin pairwise squared distances (MXU) ------------------
    d2 = pl.pallas_call(
        _dist_kernel,
        out_shape=jax.ShapeDtypeStruct((bin_pad, s_num, s_num), jnp.float32),
        grid_spec=pltpu.PrefetchScalarGridSpec(
            num_scalar_prefetch=0,
            grid=(n_blk_a,),
            in_specs=[pl.BlockSpec((bt_a, s_num, fd), lambda b: (b, 0, 0))],
            out_specs=pl.BlockSpec((bt_a, s_num, s_num), lambda b: (b, 0, 0))),
        compiler_params=cparams,
    )(feature)

    # ---- bins -> lane axis (cheap XLA transpose in HBM between the kernels) --
    d2t = jnp.transpose(d2, (1, 2, 0))                   # (S, S, bin_pad)

    # ---- kernel B: lane-dense triplet loop + per-block partial outputs -------
    unrolled = s_num <= 32
    kernel_b = functools.partial(_trip_loss_kernel, margin=float(margin),
                                 k_way=k_way, bin_num=bin_num, unrolled=unrolled)
    loss_part, dq_part = pl.pallas_call(
        kernel_b,
        out_shape=(jax.ShapeDtypeStruct((n_blk_b, 1, 1), jnp.float32),
                   jax.ShapeDtypeStruct((n_blk_b, q_num, k_way), jnp.float32)),
        grid_spec=pltpu.PrefetchScalarGridSpec(
            num_scalar_prefetch=0,
            grid=(n_blk_b,),
            in_specs=[pl.BlockSpec((s_num, s_num, bt_b), lambda b: (0, 0, b)),
                      pl.BlockSpec((s_num, s_num, 1), lambda b: (0, 0, 0))],
            out_specs=(pl.BlockSpec((1, 1, 1), lambda b: (b, 0, 0)),
                       pl.BlockSpec((1, q_num, k_way), lambda b: (b, 0, 0))),
            scratch_shapes=([] if unrolled else
                            [pltpu.VMEM((s_num, s_num, bt_b), jnp.float32)])),
        compiler_params=cparams,
    )(d2t, hp3)

    # ---- tiny XLA epilogue ----------------------------------------------------
    loss = jnp.sum(loss_part) / bin_num
    y_pred = jax.nn.softmax(-(jnp.sum(dq_part, axis=0) / bin_num), axis=1)
    return y_pred, loss


# ------------------------------ pure-JAX reference ---------------------------
def _ref_cdist(a, b):
    a_sq = jnp.sum(a * a, axis=-1, keepdims=True)
    b_sq = jnp.sum(b * b, axis=-1, keepdims=True)
    gram = jnp.einsum('...md,...nd->...mn', a, b)
    d2 = a_sq + jnp.swapaxes(b_sq, -1, -2) - 2.0 * gram
    return jnp.sqrt(jnp.maximum(d2, 0.0))


def _ref_forward(inpt, label_list, k, n, q, margin=0.2):
    label = jnp.concatenate([jnp.asarray(l) for l in label_list])
    bin_num, _, fd = inpt.shape
    support = inpt[:, :k * n, :].reshape(bin_num, k, n, fd).mean(2)
    queries = inpt[:, k * n:, :]
    feature = jnp.concatenate([support, queries], 1)
    D = _ref_cdist(feature, feature)                              # (bin, S, S)
    hp = label[:, None] == label[None, :]
    hn = ~hp
    diff = margin + D[:, :, :, None] - D[:, :, None, :]           # (bin, a, p, n)
    mask = hp[None, :, :, None] & hn[None, :, None, :]
    vals = jnp.where(mask, jnp.maximum(diff, 0.0), 0.0)
    s = vals.reshape(bin_num, -1).sum(1)
    c = jnp.where(mask & (diff > 0.0), 1.0, 0.0).reshape(bin_num, -1).sum(1)
    mean = jnp.where(c > 0.0, s / jnp.maximum(c, 1.0), 0.0)
    loss = mean.mean()
    Dq = _ref_cdist(queries, support)
    y = jax.nn.softmax(-Dq.mean(0), axis=1)
    return y, loss


# ----------------------------------- main ------------------------------------
if __name__ == "__main__":
    def make_case(key, bin_num, k_way, n_shot, query, fd):
        total = k_way * n_shot + k_way * query
        inpt = jax.random.normal(key, (bin_num, total, fd), dtype=jnp.float32)
        label_list = [jnp.arange(k_way, dtype=jnp.int32),
                      jnp.repeat(jnp.arange(k_way, dtype=jnp.int32), query)]
        return inpt, label_list

    cases = [
        dict(bin_num=3,   k_way=4, n_shot=2, query=2, fd=32),   # tiny / typical few-shot
        dict(bin_num=300, k_way=5, n_shot=3, query=3, fd=40),   # many bins -> lane-dense, multi-block
        dict(bin_num=5,   k_way=6, n_shot=1, query=5, fd=16),   # S > 32 -> fori + VMEM-scratch path
    ]
    keys = jax.random.split(jax.random.PRNGKey(0), len(cases))
    for cfg, kk in zip(cases, keys):
        inpt, label_list = make_case(kk, **cfg)
        y_pred, loss = trip_forward(inpt, label_list,
                                    cfg["k_way"], cfg["n_shot"], cfg["query"])
        jax.block_until_ready((y_pred, loss))

        y_ref, l_ref = _ref_forward(inpt, label_list,
                                    cfg["k_way"], cfg["n_shot"], cfg["query"])
        assert y_pred.shape == (cfg["k_way"] * cfg["query"], cfg["k_way"])
        assert np.allclose(np.asarray(y_pred), np.asarray(y_ref),
                           atol=1e-3, rtol=1e-3), f"y_pred mismatch for {cfg}"
        assert np.allclose(float(loss), float(l_ref),
                           atol=1e-3, rtol=1e-3), f"loss mismatch for {cfg}"
    print("KERNEL_OK")
</pallas_src>

<mosaic_0001>
module attributes {stable_mosaic.version = 11 : i64} {
  func.func @_dist_kernel(%arg0: i32, %arg1: memref<2x12x32xf32, #tpu.memory_space<vmem>>, %arg2: memref<2x12x12xf32, #tpu.memory_space<vmem>>) attributes {dimension_semantics = [#tpu.dimension_semantics<parallel>], iteration_bounds = array<i64: 2>, scalar_prefetch = 0 : i64, scratch_operands = 0 : i64, tpu.core_type = #tpu.core_type<tc>, window_params = [{transform_indices = @transform_0, window_bounds = array<i64: 2, 12, 32>}, {transform_indices = @transform_1, window_bounds = array<i64: 2, 12, 12>}]} {
    %c0 = arith.constant 0 : index
    %c0_0 = arith.constant 0 : index
    %c0_1 = arith.constant 0 : index
    %0 = vector.load %arg1[%c0, %c0_0, %c0_1] : memref<2x12x32xf32, #tpu.memory_space<vmem>>, vector<2x12x32xf32>
    %1 = arith.mulf %0, %0 : vector<2x12x32xf32>
    %cst = arith.constant dense<0.000000e+00> : vector<2x12xf32>
    %2 = vector.multi_reduction <add>, %1, %cst [2] : vector<2x12x32xf32> to vector<2x12xf32>
    %3 = vector.shape_cast %2 : vector<2x12xf32> to vector<2x12x1xf32>
    %cst_2 = arith.constant dense<0.000000e+00> : vector<2x12xf32>
    %4 = vector.multi_reduction <add>, %1, %cst_2 [2] : vector<2x12x32xf32> to vector<2x12xf32>
    %5 = vector.shape_cast %4 : vector<2x12xf32> to vector<2x1x12xf32>
    "tpu.trace_start"() <{level = 10 : i32, message = "bmd,bnd->bmn"}> : () -> ()
    %cst_3 = arith.constant dense<0.000000e+00> : vector<2x12x12xf32>
    %6 = tpu.matmul %0, %0, %cst_3 {dimension_numbers = #tpu.dot_dimension_numbers<[2], [2], [1], [1], [0, 0, 0, 1, 1, 1], [0], [0]>} : vector<2x12x32xf32>, vector<2x12x32xf32>, vector<2x12x12xf32> -> vector<2x12x12xf32>
    "tpu.trace_stop"() : () -> ()
    %7 = vector.broadcast %3 : vector<2x12x1xf32> to vector<2x12x12xf32>
    %8 = vector.broadcast %5 : vector<2x1x12xf32> to vector<2x12x12xf32>
    %9 = arith.addf %7, %8 : vector<2x12x12xf32>
    %cst_4 = arith.constant 2.000000e+00 : f32
    %10 = vector.broadcast %cst_4 : f32 to vector<2x12x12xf32>
    %11 = arith.mulf %10, %6 : vector<2x12x12xf32>
    %12 = arith.subf %9, %11 : vector<2x12x12xf32>
    %c0_5 = arith.constant 0 : index
    %c0_6 = arith.constant 0 : index
    %c0_7 = arith.constant 0 : index
    %13 = vector.load %arg2[%c0_5, %c0_6, %c0_7] : memref<2x12x12xf32, #tpu.memory_space<vmem>>, vector<2x12x12xf32>
    tpu.vector_store %arg2[%c0_5, %c0_6, %c0_7], %12 {strides = array<i32>} : memref<2x12x12xf32, #tpu.memory_space<vmem>>, vector<2x12x12xf32>,
    return
  }
  func.func @transform_0(%arg0: i32) -> (i32, i32, i32) {
    %c0_i32 = arith.constant 0 : i32
    %c0_i32_0 = arith.constant 0 : i32
    %c0_i32_1 = arith.constant 0 : i32
    return %arg0, %c0_i32, %c0_i32_0 : i32, i32, i32
  }
  func.func @transform_1(%arg0: i32) -> (i32, i32, i32) {
    %c0_i32 = arith.constant 0 : i32
    %c0_i32_0 = arith.constant 0 : i32
    %c0_i32_1 = arith.constant 0 : i32
    return %arg0, %c0_i32, %c0_i32_0 : i32, i32, i32
  }
}

</mosaic_0001>

<bundles_post_ra>
// kernel: tpu_custom_call.1
= control target key start
LH: loop header
LB: loop body
LE: loop exit
PB: predicated region body
PF: predicated region fallthrough
CT: control target
= control target key end

     0   :  { %s370_s6 = smov 0   ;;  %s408_s0 = inlined_call_operand.vmem [shape: f32[4,12,32], index: 0, kind: input, shape index: {}]   ;;  %s409_s1 = inlined_call_operand.vmem [shape: f32[4,12,12], index: 1, kind: output, shape index: {}]  }
   0x1 LB: > { %s317_s7 = sadd.s32 4294967295, %s358_s6   ;;  %p321_p0 = scmp.ge.s32.totalorder %s358_s6, 1  ;;  %s358_s6 = sphi %s370_s6, %s11_s6  }
   0x2   : > { %p89_p1 = scmp.lt.s32.totalorder %s358_s6, 3 }
   0x4   : > { %p90_p2 = pnand %p321_p0, %p89_p1 }
   0x5   : > { %s322_s8 = sshll.u32 (!%p90_p2), %s317_s7, 1 }
   0x6   : > { %93 = sbr.rel (%p90_p2) target bundleno = 161 (0xa1), region = 24  ;;  %p112_p3 = scmp.lt.s32.totalorder (!%p90_p2), %s322_s8, 3 }
   0xb   : > { %s411_s8 = smov (!%p112_p3, %s322_s8), 3  ;;  %vm133_vm0 = vcmask 261120   ;;  %vm137_vm1 = vcmask 257024   ;;  %v209_v12 = vlaneseq  ;;  %vm214_vm2 = vcmask 130112  }
   0xc   : > { %s338_s9 = sshll.u32 %s411_s8, 4  ;;  %vm253_vm3 = vcmask 97280   ;;  %vm255_vm4 = vcmask 93184  }
   0xd   : > { %s116_s12 = scalar_lea.vmem %s408_s0, %s338_s9  ;;  %v210_v14 = vand.u32 127, %v209_v12  ;;  %s123_s15 = scalar_lea.vmem %s409_s1, %s338_s9 }
   0xe   : > { %v126_v0 = vld [vmem:[%s116_s12 + $0x8] sm:$0xf]  ;;  %v128_v1 = vld [vmem:[%s116_s12 + $0x18] sm:$0xf]  ;;  %v127_v2 = vld [vmem:[%s116_s12 + $0x10] sm:$0xff] }
   0xf   : > { %328 = vmatpush.xpose.msk.msra.mxu0 %vm133_vm0, %v126_v0  ;;  %340 = vmatpush.xpose.msk.msra.mxu2 %vm133_vm0, %v126_v0  ;;  %v131_v3 = vmul.f32 %v127_v2, %v127_v2  ;;  %v125_v4 = vld [vmem:[%s116_s12] sm:$0xff]  ;;  %v132_v8 = vmul.f32 %v128_v1, %v128_v1  ;;  %v130_v9 = vmul.f32 %v126_v0, %v126_v0  ;;  %v212_v16 = vadd.s32 4294967288, %v210_v14 }
  0x10   : > { %332 = vmatpush.xpose.msk.msra.mxu1 %vm133_vm0, %v128_v1  ;;  %342 = vmatpush.xpose.msk.msra.mxu3 %vm133_vm0, %v128_v1  ;;  %v129_v5 = vmul.f32 %v125_v4, %v125_v4 }
  0x11   : > { %v141_v6 = vsel %vm133_vm0, %v131_v3, 0.0  ;;  %v144_v10 = vsel %vm137_vm1, %v132_v8, 0.0  ;;  %v138_v11 = vsel %vm137_vm1, %v130_v9, 0.0 }
  0x12   : > { %142 = vadd.xlane.f32.xlu1 %v141_v6  ;;  %v134_v7 = vsel %vm133_vm0, %v129_v5, 0.0 }
  0x13   : > { %135 = vadd.xlane.f32.xlu0 %v134_v7  ;;  %329 = vmatpush.xpose.msk.msra.mxu0 %vm133_vm0, %v125_v4 }
  0x14   : > { %341 = vmatpush.xpose.msk.msra.mxu2 %vm133_vm0, %v125_v4  ;;  %333 = vmatpush.xpose.msk.msra.mxu1 %vm133_vm0, %v127_v2 }
  0x15   : > { %343 = vmatpush.xpose.msk.msra.mxu3 %vm133_vm0, %v127_v2 }
  0x16   : > { %330 = vmatmul.msk.f32.vlgmr.msra.gmra.mxu0 %vm133_vm0, %v125_v4 }
  0x17   : > { %331 = vmatmul.msk.f32.vlgmr.msra.gmra.mxu2 %vm133_vm0, %v126_v0  ;;  %334 = vmatmul.msk.f32.vlgmr.msra.gmra.mxu1 %vm133_vm0, %v127_v2 }
  0x18   : > { %335 = vmatmul.msk.f32.vlgmr.msra.gmra.mxu3 %vm133_vm0, %v128_v1 }
  0x1a   : > { %145 = vadd.xlane.f32.xlu1 %v144_v10 }
  0x1b   : > { %139 = vadd.xlane.f32.xlu0 %v138_v11 }
  0x85   : > { %v143_v13 = vpop.xlane.xlu1 %142 }
  0x86   : > { %v136_v15 = vpop.xlane.xlu0 %135  ;;  %v216_v19 = vperm.slane %v143_v13, %v210_v14 }
  0x87   : > { %v211_v17 = vperm.slane %v136_v15, %v210_v14 }
  0x8d   : > { %v146_v18 = vpop.xlane.xlu1 %145 }
  0x8e   : > { %v217_v20 = vperm.slane %v146_v18, %v212_v16  ;;  %v140_v21 = vpop.xlane.xlu0 %139 }
  0x8f   : > { %v213_v22 = vperm.slane %v140_v21, %v212_v16 }
  0x90   : > { %v218_v24 = vsel %vm214_vm2, %v217_v20, %v216_v19 }
  0x91   : > { %v215_v23 = vsel %vm214_vm2, %v213_v22, %v211_v17  ;;  %v243_v29 = vadd.f32 %v218_v24, %v143_v13  ;;  %v244_v37 = vadd.f32 %v218_v24, %v146_v18 }
  0x92   : > { %v241_v26 = vadd.f32 %v215_v23, %v136_v15  ;;  %v242_v34 = vadd.f32 %v215_v23, %v140_v21 }
  0x93   : > { %v170_v25 = vpop.f32.mrf.mxu0 }
  0x94   : > { %v245_v27 = vmul.f32 2.0, %v170_v25  ;;  %v199_v28 = vpop.f32.mrf.mxu1 }
  0x95   : > { %v247_v30 = vmul.f32 2.0, %v199_v28 }
  0x96   : > { %v249_v31 = vsub.f32 %v241_v26, %v245_v27 }
  0x97   : > { %v251_v32 = vsub.f32 %v243_v29, %v247_v30 }
  0x98   : > { %254 = vst.msk [vmem:[%s123_s15] sm:$0xff] %vm253_vm3, %v249_v31 }
  0x99   : > { %257 = vst.msk [vmem:[%s123_s15 + $0x10] sm:$0xff] %vm253_vm3, %v251_v32 }
  0x9a   : > { %v173_v33 = vpop.f32.mrf.mxu2 }
  0x9b   : > { %v246_v35 = vmul.f32 2.0, %v173_v33  ;;  %v202_v36 = vpop.f32.mrf.mxu3 }
  0x9c   : > { %v248_v38 = vmul.f32 2.0, %v202_v36 }
  0x9d   : > { %v250_v39 = vsub.f32 %v242_v34, %v246_v35 }
  0x9e   : > { %v252_v40 = vsub.f32 %v244_v37, %v248_v38 }
  0x9f   : > { %256 = vst.msk [vmem:[%s123_s15 + $0x8] sm:$0xf] %vm255_vm4, %v250_v39 }
  0xa0   : > { %258 = vst.msk [vmem:[%s123_s15 + $0x18] sm:$0xf] %vm255_vm4, %v252_v40 }
  0xa1 PF: > { %s11_s6 = sadd.s32 1, %s358_s6  }
  0xa2   : > { %p8_p4 = scmp.ge.s32.totalorder %s11_s6, 4  }
  0xa4   :  { %10 = sbr.rel (!%p8_p4) target bundleno = 1 (0x1), region = 54 }

</bundles_post_ra>
